<compile_context>
chip_gen: v6e
topology: v6e:2x2x1
jax: 0.10.0
libtpu: 0.0.40
codegen_flags: <defaults>
</compile_context>

<pallas_src>
import jax
import jax.numpy as jnp
from jax.experimental import pallas as pl
from jax.experimental.pallas import tpu as pltpu


def lossav_kernel(x_ref, wd_ref, scalars_ref, pred_ref, stats_ref):
    """
    x_ref:       (T, 128) f32  VMEM   frame features (already squeezed)
    wd_ref:      (1, 128) f32  VMEM   W[:,1] - W[:,0]  (FC difference weights)
    scalars_ref: (3,)     f32  SMEM   [1/r, bias[1]-bias[0], video_label]
    pred_ref:    (T, 2)   f32  VMEM   predScore = softmax(logits)
    stats_ref:   (1, 128) f32  VMEM   lanes 0..3 = [nloss, predLabel,
                                                    correctNum, video_prob]
    """
    T = x_ref.shape[0]

    inv_r = scalars_ref[0]
    b_d = scalars_ref[1]
    video_label = scalars_ref[2]

    x = x_ref[...]                                    # (T, 128)
    wd = wd_ref[...]                                  # (1, 128)

    # d[t] = logits[t,1] - logits[t,0] = x[t] . (w1 - w0) + (b1 - b0)
    # One VPU multiply + one lane reduction; no MXU / padded weight needed.
    d = jnp.sum(x * wd, axis=-1, keepdims=True) + b_d  # (T, 1)

    # 2-class softmax == sigmoid of the logit difference.
    p1_r = 1.0 / (1.0 + jnp.exp(-d * inv_r))           # frame_probs[:, 1]
    p1 = 1.0 / (1.0 + jnp.exp(-d))                     # predScore[:, 1]

    # predScore = [1 - p1, p1], only the 2 real columns (no 128-lane padding).
    lane2 = jax.lax.broadcasted_iota(jnp.int32, (T, 2), 1)
    pred_ref[...] = jnp.where(lane2 == 1, p1, 1.0 - p1)

    # weighted_avg voting:
    #   conf    = max over classes          = max(p1_r, 1 - p1_r)
    #   weights = softmax(conf over frames)
    #   video_prob = sum(weights * p1_r)  =  sum(e^conf * p1_r) / sum(e^conf)
    conf = jnp.maximum(p1_r, 1.0 - p1_r)               # (T, 1)
    cmax = jnp.max(conf, axis=0, keepdims=True)        # (1, 1)
    ew = jnp.exp(conf - cmax)                          # (T, 1)
    num = jnp.sum(ew * p1_r, axis=0, keepdims=True)    # (1, 1)
    den = jnp.sum(ew, axis=0, keepdims=True)           # (1, 1)
    video_prob = num / den                             # single exact scalar div

    # clamp + BCE against the (precomputed) video label.
    eps = jnp.float32(1e-7)
    vp = jnp.clip(video_prob, eps, 1.0 - eps)          # (1, 1)
    nloss = -(video_label * jnp.log(vp)
              + (1.0 - video_label) * jnp.log(1.0 - vp))

    pred_label = jnp.round(vp)
    correct = (pred_label == video_label).astype(jnp.float32)

    # Pack all scalar results into one lane-dense (1,128) row -> single
    # unmasked vst + single writeback DMA instead of three (1,1) outputs.
    lane = jax.lax.broadcasted_iota(jnp.int32, stats_ref.shape, 1)
    stats_ref[...] = jnp.where(
        lane == 0, nloss,
        jnp.where(lane == 1, pred_label,
                  jnp.where(lane == 2, correct,
                            jnp.where(lane == 3, video_prob, 0.0))))


def prepare_params(W, bias):
    """One-time FC parameter prep (hoisted out of the per-call forward).

    W: (128, 2), bias: (2,)  ->  wd: (1, 128) = W[:,1]-W[:,0],  bd = b1-b0.
    """
    W = W.astype(jnp.float32)
    bias = bias.astype(jnp.float32)
    wd = (W[:, 1] - W[:, 0]).reshape(1, -1)
    bd = bias[1] - bias[0]
    return wd, bd


def loss_av_forward(x, labels, wd, bd, r=1.0):
    """x: (T, 1, 128) f32, labels: (T,), wd/bd from prepare_params()."""
    T = x.shape[0]
    D = wd.shape[1]

    x2 = x.reshape(T, D).astype(jnp.float32)           # squeeze(1)

    # video_label = round(mean(frame_labels)) — trivial scalar, done in the
    # wrapper so the (T,1) labels tensor never travels to VMEM.
    video_label = jnp.round(jnp.mean(labels.astype(jnp.float32)))

    scalars = jnp.stack([jnp.asarray(1.0 / r, jnp.float32),
                         bd.astype(jnp.float32),
                         video_label])                  # (3,) SMEM

    out_shapes = (
        jax.ShapeDtypeStruct((T, 2), jnp.float32),      # predScore
        jax.ShapeDtypeStruct((1, 128), jnp.float32),    # packed scalar stats
    )

    vmem = pl.BlockSpec(memory_space=pltpu.MemorySpace.VMEM)
    smem = pl.BlockSpec(memory_space=pltpu.MemorySpace.SMEM)

    pred_score, stats = pl.pallas_call(
        lossav_kernel,
        out_shape=out_shapes,
        in_specs=[vmem, vmem, smem],
        out_specs=(vmem, vmem),
    )(x2, wd, scalars)

    nloss = stats[0, 0]
    pred_label = stats[0, 1]
    correct_num = stats[0, 2]
    return nloss, pred_score, pred_label, correct_num


def _reference(x, labels, W, bias, r=1.0):
    """Pure-JAX reference of lossAV.forward (weighted_avg voting)."""
    T = x.shape[0]
    xf = x.reshape(T, -1).astype(jnp.float32)
    logits = xf @ W.astype(jnp.float32) + bias.astype(jnp.float32)
    frame_probs = jax.nn.softmax(logits / r, axis=-1)
    conf = jnp.max(frame_probs, axis=1)
    weights = jax.nn.softmax(conf, axis=0)
    video_prob = jnp.sum(weights * frame_probs[:, 1])
    video_label = jnp.round(jnp.mean(labels.astype(jnp.float32)))
    vp = jnp.clip(video_prob, 1e-7, 1.0 - 1e-7)
    nloss = -(video_label * jnp.log(vp) + (1.0 - video_label) * jnp.log(1.0 - vp))
    predScore = jax.nn.softmax(logits, axis=-1)
    predLabel = jnp.round(vp)
    correctNum = (predLabel == video_label).astype(jnp.float32)
    return nloss, predScore, predLabel, correctNum


if __name__ == "__main__":
    key = jax.random.PRNGKey(0)
    kx, kw, kb, kl = jax.random.split(key, 4)

    T, D = 8, 128                  # 8 frames, hidden 128 (fixed by Linear(128, 2))
    x = jax.random.normal(kx, (T, 1, D), jnp.float32)
    W = jax.random.normal(kw, (D, 2), jnp.float32) * 0.05
    bias = jax.random.normal(kb, (2,), jnp.float32) * 0.05
    labels = jax.random.bernoulli(kl, 0.5, (T,)).astype(jnp.float32)

    # one-time parameter prep (per perf feedback: no per-call padding/scatter)
    wd, bd = prepare_params(W, bias)

    nloss, predScore, predLabel, correctNum = loss_av_forward(
        x, labels, wd, bd, r=1.0)
    jax.block_until_ready((nloss, predScore, predLabel, correctNum))

    # sanity check vs pure-JAX reference
    rn, rs, rl, rc = _reference(x, labels, W, bias, r=1.0)
    assert jnp.allclose(nloss, rn, atol=1e-4), (nloss, rn)
    assert jnp.allclose(predScore, rs, atol=1e-5)
    assert jnp.allclose(predLabel, rl), (predLabel, rl)
    assert jnp.allclose(correctNum, rc), (correctNum, rc)

    print("KERNEL_OK")
</pallas_src>

<mosaic_0001>
module attributes {stable_mosaic.version = 11 : i64} {
  func.func @lossav_kernel(%arg0: memref<8x128xf32, #tpu.memory_space<vmem>>, %arg1: memref<1x128xf32, #tpu.memory_space<vmem>>, %arg2: memref<3xf32, #tpu.memory_space<smem>>, %arg3: memref<8x2xf32, #tpu.memory_space<vmem>>, %arg4: memref<1x128xf32, #tpu.memory_space<vmem>>) attributes {dimension_semantics = [], scalar_prefetch = 0 : i64, scratch_operands = 0 : i64, tpu.core_type = #tpu.core_type<tc>} {
    %c0 = arith.constant 0 : index
    %0 = memref.load %arg2[%c0] : memref<3xf32, #tpu.memory_space<smem>>
    %c1 = arith.constant 1 : index
    %1 = memref.load %arg2[%c1] : memref<3xf32, #tpu.memory_space<smem>>
    %c2 = arith.constant 2 : index
    %2 = memref.load %arg2[%c2] : memref<3xf32, #tpu.memory_space<smem>>
    %c0_0 = arith.constant 0 : index
    %c0_1 = arith.constant 0 : index
    %3 = vector.load %arg0[%c0_0, %c0_1] : memref<8x128xf32, #tpu.memory_space<vmem>>, vector<8x128xf32>
    %c0_2 = arith.constant 0 : index
    %c0_3 = arith.constant 0 : index
    %4 = vector.load %arg1[%c0_2, %c0_3] : memref<1x128xf32, #tpu.memory_space<vmem>>, vector<1x128xf32>
    %5 = vector.broadcast %4 : vector<1x128xf32> to vector<8x128xf32>
    %6 = arith.mulf %3, %5 : vector<8x128xf32>
    %cst = arith.constant dense<0.000000e+00> : vector<8xf32>
    %7 = vector.multi_reduction <add>, %6, %cst [1] : vector<8x128xf32> to vector<8xf32>
    %8 = vector.shape_cast %7 : vector<8xf32> to vector<8x1xf32>
    %9 = vector.broadcast %1 : f32 to vector<8x1xf32>
    %10 = arith.addf %8, %9 : vector<8x1xf32>
    %cst_4 = arith.constant 0.000000e+00 : f32
    %11 = vector.broadcast %cst_4 : f32 to vector<8x1xf32>
    %12 = arith.subf %11, %10 : vector<8x1xf32>
    %13 = vector.broadcast %0 : f32 to vector<8x1xf32>
    %14 = arith.mulf %12, %13 : vector<8x1xf32>
    %15 = math.exp %14 : vector<8x1xf32>
    %cst_5 = arith.constant 1.000000e+00 : f32
    %16 = vector.broadcast %cst_5 : f32 to vector<8x1xf32>
    %17 = arith.addf %16, %15 : vector<8x1xf32>
    %cst_6 = arith.constant 1.000000e+00 : f32
    %18 = vector.broadcast %cst_6 : f32 to vector<8x1xf32>
    %19 = arith.divf %18, %17 : vector<8x1xf32>
    %cst_7 = arith.constant 0.000000e+00 : f32
    %20 = vector.broadcast %cst_7 : f32 to vector<8x1xf32>
    %21 = arith.subf %20, %10 : vector<8x1xf32>
    %22 = math.exp %21 : vector<8x1xf32>
    %cst_8 = arith.constant 1.000000e+00 : f32
    %23 = vector.broadcast %cst_8 : f32 to vector<8x1xf32>
    %24 = arith.addf %23, %22 : vector<8x1xf32>
    %cst_9 = arith.constant 1.000000e+00 : f32
    %25 = vector.broadcast %cst_9 : f32 to vector<8x1xf32>
    %26 = arith.divf %25, %24 : vector<8x1xf32>
    %27 = tpu.iota {dimensions = array<i32: 1>} : vector<8x2xi32>
    %c1_i32 = arith.constant 1 : i32
    %28 = vector.broadcast %c1_i32 : i32 to vector<8x2xi32>
    %29 = arith.cmpi eq, %27, %28 : vector<8x2xi32>
    %cst_10 = arith.constant 1.000000e+00 : f32
    %30 = vector.broadcast %cst_10 : f32 to vector<8x1xf32>
    %31 = arith.subf %30, %26 : vector<8x1xf32>
    %32 = vector.shape_cast %26 : vector<8x1xf32> to vector<8x1xf32>
    %33 = vector.broadcast %32 : vector<8x1xf32> to vector<8x2xf32>
    %34 = vector.shape_cast %31 : vector<8x1xf32> to vector<8x1xf32>
    %35 = vector.broadcast %34 : vector<8x1xf32> to vector<8x2xf32>
    %36 = arith.select %29, %33, %35 : vector<8x2xi1>, vector<8x2xf32>
    %c0_11 = arith.constant 0 : index
    %c0_12 = arith.constant 0 : index
    %37 = vector.load %arg3[%c0_11, %c0_12] : memref<8x2xf32, #tpu.memory_space<vmem>>, vector<8x2xf32>
    tpu.vector_store %arg3[%c0_11, %c0_12], %36 {strides = array<i32>} : memref<8x2xf32, #tpu.memory_space<vmem>>, vector<8x2xf32>,
    %cst_13 = arith.constant 1.000000e+00 : f32
    %38 = vector.broadcast %cst_13 : f32 to vector<8x1xf32>
    %39 = arith.subf %38, %19 : vector<8x1xf32>
    %40 = arith.maximumf %19, %39 : vector<8x1xf32>
    %cst_14 = arith.constant dense<0xFF800000> : vector<1xf32>
    %41 = vector.multi_reduction <maximumf>, %40, %cst_14 [0] : vector<8x1xf32> to vector<1xf32>
    %42 = vector.shape_cast %41 : vector<1xf32> to vector<1x1xf32>
    %43 = vector.broadcast %42 : vector<1x1xf32> to vector<8x1xf32>
    %44 = arith.subf %40, %43 : vector<8x1xf32>
    %45 = math.exp %44 : vector<8x1xf32>
    %46 = arith.mulf %45, %19 : vector<8x1xf32>
    %cst_15 = arith.constant dense<0.000000e+00> : vector<1xf32>
    %47 = vector.multi_reduction <add>, %46, %cst_15 [0] : vector<8x1xf32> to vector<1xf32>
    %48 = vector.shape_cast %47 : vector<1xf32> to vector<1x1xf32>
    %cst_16 = arith.constant dense<0.000000e+00> : vector<1xf32>
    %49 = vector.multi_reduction <add>, %45, %cst_16 [0] : vector<8x1xf32> to vector<1xf32>
    %50 = vector.shape_cast %49 : vector<1xf32> to vector<1x1xf32>
    %51 = arith.divf %48, %50 : vector<1x1xf32>
    %cst_17 = arith.constant 1.000000e+00 : f32
    %cst_18 = arith.constant 1.000000e-07 : f32
    %52 = arith.subf %cst_17, %cst_18 : f32
    %cst_19 = arith.constant 1.000000e-07 : f32
    %53 = vector.broadcast %cst_19 : f32 to vector<1x1xf32>
    %54 = arith.maximumf %53, %51 : vector<1x1xf32>
    %55 = vector.broadcast %52 : f32 to vector<1x1xf32>
    %56 = arith.minimumf %55, %54 : vector<1x1xf32>
    %57 = math.log %56 : vector<1x1xf32>
    %58 = vector.broadcast %2 : f32 to vector<1x1xf32>
    %59 = arith.mulf %58, %57 : vector<1x1xf32>
    %cst_20 = arith.constant 1.000000e+00 : f32
    %60 = arith.subf %cst_20, %2 : f32
    %cst_21 = arith.constant 1.000000e+00 : f32
    %61 = vector.broadcast %cst_21 : f32 to vector<1x1xf32>
    %62 = arith.subf %61, %56 : vector<1x1xf32>
    %63 = math.log %62 : vector<1x1xf32>
    %64 = vector.broadcast %60 : f32 to vector<1x1xf32>
    %65 = arith.mulf %64, %63 : vector<1x1xf32>
    %66 = arith.addf %59, %65 : vector<1x1xf32>
    %cst_22 = arith.constant 0.000000e+00 : f32
    %67 = vector.broadcast %cst_22 : f32 to vector<1x1xf32>
    %68 = arith.subf %67, %66 : vector<1x1xf32>
    %69 = math.roundeven %56 : vector<1x1xf32>
    %70 = vector.broadcast %2 : f32 to vector<1x1xf32>
    %71 = arith.cmpf oeq, %69, %70 : vector<1x1xf32>
    %72 = arith.extui %71 : vector<1x1xi1> to vector<1x1xi32>
    %73 = arith.sitofp %72 : vector<1x1xi32> to vector<1x1xf32>
    %74 = tpu.iota {dimensions = array<i32: 1>} : vector<1x128xi32>
    %c0_i32 = arith.constant 0 : i32
    %75 = vector.broadcast %c0_i32 : i32 to vector<1x128xi32>
    %76 = arith.cmpi eq, %74, %75 : vector<1x128xi32>
    %c1_i32_23 = arith.constant 1 : i32
    %77 = vector.broadcast %c1_i32_23 : i32 to vector<1x128xi32>
    %78 = arith.cmpi eq, %74, %77 : vector<1x128xi32>
    %c2_i32 = arith.constant 2 : i32
    %79 = vector.broadcast %c2_i32 : i32 to vector<1x128xi32>
    %80 = arith.cmpi eq, %74, %79 : vector<1x128xi32>
    %c3_i32 = arith.constant 3 : i32
    %81 = vector.broadcast %c3_i32 : i32 to vector<1x128xi32>
    %82 = arith.cmpi eq, %74, %81 : vector<1x128xi32>
    %cst_24 = arith.constant 0.000000e+00 : f32
    %83 = vector.shape_cast %51 : vector<1x1xf32> to vector<1x1xf32>
    %84 = vector.broadcast %83 : vector<1x1xf32> to vector<1x128xf32>
    %85 = vector.broadcast %cst_24 : f32 to vector<1x128xf32>
    %86 = arith.select %82, %84, %85 : vector<1x128xi1>, vector<1x128xf32>
    %87 = vector.shape_cast %73 : vector<1x1xf32> to vector<1x1xf32>
    %88 = vector.broadcast %87 : vector<1x1xf32> to vector<1x128xf32>
    %89 = arith.select %80, %88, %86 : vector<1x128xi1>, vector<1x128xf32>
    %90 = vector.shape_cast %69 : vector<1x1xf32> to vector<1x1xf32>
    %91 = vector.broadcast %90 : vector<1x1xf32> to vector<1x128xf32>
    %92 = arith.select %78, %91, %89 : vector<1x128xi1>, vector<1x128xf32>
    %93 = vector.shape_cast %68 : vector<1x1xf32> to vector<1x1xf32>
    %94 = vector.broadcast %93 : vector<1x1xf32> to vector<1x128xf32>
    %95 = arith.select %76, %94, %92 : vector<1x128xi1>, vector<1x128xf32>
    %c0_25 = arith.constant 0 : index
    %c0_26 = arith.constant 0 : index
    %96 = vector.load %arg4[%c0_25, %c0_26] : memref<1x128xf32, #tpu.memory_space<vmem>>, vector<1x128xf32>
    tpu.vector_store %arg4[%c0_25, %c0_26], %95 {strides = array<i32>} : memref<1x128xf32, #tpu.memory_space<vmem>>, vector<1x128xf32>,
    return
  }
}

</mosaic_0001>

<bundles_post_ra>
// kernel: tpu_custom_call.1
= control target key start
LH: loop header
LB: loop body
LE: loop exit
PB: predicated region body
PF: predicated region fallthrough
CT: control target
= control target key end

     0   :  { %10 = vsyncpa [#allocation3], 0  ;;  %s294_s0 = inlined_call_operand.hbm [shape: f32[8,128], index: 0, kind: input, shape index: {}]   ;;  %s295_s1 = inlined_call_operand.vmem [shape: f32[1,128], index: 1, kind: input, shape index: {}]   ;;  %s296_s2 = inlined_call_operand.vmem [shape: f32[3], index: 2, kind: input, shape index: {}]   ;;  %s297_s3 = inlined_call_operand.vmem [shape: f32[8,2], index: 3, kind: output, shape index: {0}]   ;;  %s298_s4 = inlined_call_operand.hbm [shape: f32[1,128], index: 4, kind: output, shape index: {1}]  }
   0x1   :  { %11 = vsyncpa [#allocation5], 0 }
   0x2   :  { %12 = vsyncpa [#allocation4], 0  ;;  %s31_s17 = sshll.u32 %s296_s2, 4  ;;  %s240_s18 = smov [#allocation2]   ;;  %s32_s17 = int_to_ptr.vmem [resolvable:$true] %s31_s17 }
   0x3   :  { %s19_s19 = sshll.u32 %s240_s18, 4  ;;  %s20_s19 = int_to_ptr.vmem [resolvable:$true] %s19_s19 }
   0x4   :  { %s190_s20 = scalar_lea.vmem %s20_s19, 128  ;;  %p195_p1 = scmp.lt.s32.totalorder %s20_s19, %s20_s19 }
   0x5   :  { %p191_p0 = scmp.ne.s32.totalorder %s20_s19, %s190_s20  ;;  %p196_p2 = scmp.lt.s32.totalorder %s190_s20, %s190_s20 }
   0x7   :  { %p197_p3 = por %p196_p2, %p195_p1 }
   0x9   :  { %p198_p4 = pnand %p197_p3, %p191_p0 }
   0xb   :  { %201 = shalt.err (!%p198_p4)
}
   0xc   :  { %22 = dma.hbm_to_vmem [thread:$0]  %s294_s0, 128, %s20_s19, [#allocation3]  }
   0xd   :  { %s202_s23 = scalar_lea.vmem %s32_s17, 16  ;;  %p207_p6 = scmp.lt.s32.totalorder %s32_s17, %s32_s17 }
   0xe   :  { %p203_p5 = scmp.ne.s32.totalorder %s32_s17, %s202_s23  ;;  %p208_p7 = scmp.lt.s32.totalorder %s202_s23, %s202_s23 }
  0x10   :  { %p209_p8 = por %p208_p7, %p207_p6 }
  0x12   :  { %p210_p9 = pnand %p209_p8, %p203_p5 }
  0x14   :  { %213 = shalt.err (!%p210_p9)
}
  0x15   :  { %s241_s2 = smov [#allocation6]  }
  0x16   :  { %34 = dma.vmem_to_smem %s32_s17, 16, %s241_s2, [#allocation5]  }
  0x17   :  { %234 = dma.done.wait [#allocation3], 128  }
  0x18   :  { %235 = vsyncadd [#allocation3], 4294967168 }
  0x19   :  { %236 = dma.done.wait [#allocation5], 16  }
  0x1a   :  { %237 = vsyncadd [#allocation5], 4294967280 }
  0x1b   :  { %41 = sfence }
  0x1c   :  { %v45_v0 = vld [vmem:[#allocation2] sm:$0xff]  ;;  %s150_s0 = sld [smem:[#allocation6 + $0x1]]  ;;  %v71_v15 = vlaneseq  ;;  %vm76_vm1 = vcmask 15360   ;;  %v242_v63 = vmov 0.0   ;;  %s243_s29 = smov [#allocation7]  }
  0x1d   :  { %v152_v1 = vld [vmem:[%s295_s1] ss:$0 sm:$0xff]  ;;  %s42_s26 = sld [smem:[#allocation6]]  ;;  %s138_s30 = sshll.u32 %s243_s29, 4  ;;  %s139_s30 = int_to_ptr.vmem [resolvable:$true] %s138_s30 }
  0x1e   :  { %v53_v2 = vmul.f32 %v152_v1, %v45_v0  ;;  %v278_v16 = vand.u32 127, %v71_v15  ;;  %s214_s5 = scalar_lea.vmem %s139_s30, 16  ;;  %s218_s6 = scalar_lea.vmem %s139_s30, 32 }
  0x1f   :  { %p215_p10 = scmp.ne.s32.totalorder %s139_s30, %s214_s5  ;;  %p219_p11 = scmp.lt.s32.totalorder %s139_s30, %s139_s30 }
  0x20   :  { %54 = vadd.xlane.f32.xlu0 %v53_v2  ;;  %vm73_vm0 = vcmp.eq.s32.totalorder %v278_v16, 1  ;;  %vm124_vm4 = vcmp.eq.s32.totalorder %v278_v16, 3  ;;  %vm123_vm5 = vcmp.eq.s32.totalorder %v278_v16, 2  ;;  %vm122_vm6 = vcmp.eq.s32.totalorder %v278_v16, 0  ;;  %p220_p12 = scmp.lt.s32.totalorder %s218_s6, %s214_s5 }
  0x22   :  { %v56_v3 = vstv %s150_s0  ;;  %p221_p13 = por %p220_p12, %p219_p11 }
  0x23   :  { %v59_v6 = vstv %s42_s26 }
  0x24   :  { %p222_p0 = pnand %p221_p13, %p215_p10 }
  0xa9   :  { %v55_v4 = vpop.xlane.xlu0 %54 }
  0xaa   :  { %v57_v5 = vadd.f32 %v56_v3, %v55_v4 }
  0xac   :  { %v58_v7 = vsub.f32 0.0, %v57_v5 }
  0xae   :  { %v60_v8 = vmul.f32 %v59_v6, %v58_v7  ;;  %v66_v9 = vmul.f32 1.442695, %v58_v7 }
  0xb0   :  { %v61_v10 = vmul.f32 1.442695, %v60_v8  ;;  %166 = vpow2.f32 %v66_v9 }
  0xb2   :  { %168 = vpow2.f32 %v61_v10 }
  0xbd   :  { %v167_v11 = vpop.eup %166 }
  0xbe   :  { %v68_v12 = vadd.f32 1.0, %v167_v11 }
  0xbf   :  { %v169_v13 = vpop.eup %168 }
  0xc0   :  { %v63_v14 = vadd.f32 1.0, %v169_v13  ;;  %170 = vrcp.f32 %v68_v12 }
  0xc2   :  { %172 = vrcp.f32 %v63_v14 }
  0xcd   :  { %v171_v17 = vpop.eup %170 }
  0xce   :  { %v74_v18 = vsub.f32 1.0, %v171_v17 }
  0xcf   :  { %v173_v19 = vpop.eup %172 }
  0xd0   :  { %v78_v20 = vsub.f32 1.0, %v173_v19  ;;  %v75_v21 = vsel %vm73_vm0, %v171_v17, %v74_v18 }
  0xd1   :  { %77 = vst.msk [vmem:[%s297_s3] sm:$0xff] %vm76_vm1, %v75_v21  ;;  %s151_s3 = sld [smem:[#allocation6 + $0x2]] }
  0xd2   :  { %v79_v22 = vmax.f32 %v173_v19, %v78_v20 }
  0xd4   :  { %v80_v23 = vrot.slane %v79_v22, 4 }
  0xd6   :  { %v81_v24 = vmax.f32 %v79_v22, %v80_v23 }
  0xd7   :  { %v108_v56 = vstv %s151_s3  ;;  %s110_s28 = ssub.f32 1.0, %s151_s3 }
  0xd8   :  { %v82_v25 = vrot.slane %v81_v24, 2 }
  0xd9   :  { %v114_v61 = vstv %s110_s28 }
  0xda   :  { %v83_v26 = vmax.f32 %v81_v24, %v82_v25 }
  0xdc   :  { %v84_v27 = vrot.slane %v83_v26, 1 }
  0xde   :  { %v85_v28 = vmax.f32 %v83_v26, %v84_v27 }
  0xe0   :  { %v86_v29 = vsub.f32 %v79_v22, %v85_v28 }
  0xe2   :  { %v87_v30 = vmul.f32 1.442695, %v86_v29 }
  0xe4   :  { %174 = vpow2.f32 %v87_v30 }
  0xf1   :  { %v175_v31 = vpop.eup %174 }
  0xf2   :  { %v89_v32 = vmul.f32 %v175_v31, %v173_v19  ;;  %v96_v33 = vrot.slane %v175_v31, 4 }
  0xf4   :  { %v97_v34 = vadd.f32 %v175_v31, %v96_v33  ;;  %v90_v35 = vrot.slane %v89_v32, 4 }
  0xf6   :  { %v98_v36 = vrot.slane %v97_v34, 2  ;;  %v91_v38 = vadd.f32 %v90_v35, %v89_v32 }
  0xf8   :  { %v99_v37 = vadd.f32 %v98_v36, %v97_v34  ;;  %v92_v41 = vrot.slane %v91_v38, 2 }
  0xfa   :  { %v100_v39 = vrot.slane %v99_v37, 1  ;;  %v93_v42 = vadd.f32 %v92_v41, %v91_v38 }
  0xfc   :  { %v101_v40 = vadd.f32 %v100_v39, %v99_v37  ;;  %v94_v43 = vrot.slane %v93_v42, 1 }
  0xfe   :  { %176 = vrcp.f32 %v101_v40  ;;  %v95_v44 = vadd.f32 %v94_v43, %v93_v42 }
 0x10b   :  { %v177_v45 = vpop.eup %176 }
 0x10c   :  { %v103_v46 = vmul.f32 %v177_v45, %v95_v44 }
 0x10e   :  { %v104_v47 = vmax.f32 %v103_v46, 1e-07  ;;  %v125_v3 = vsel %vm124_vm4, %v103_v46, 0.0 }
 0x110   :  { %v105_v48 = vmin.f32 %v104_v47, 0.9999999 }
 0x112   :  { %178 = vlog2.f32 %v105_v48  ;;  %v111_v49 = vsub.f32 1.0, %v105_v48  ;;  %v156_v50 = vcvt.f32.s32 %v105_v48  ;;  %v159_v53 = vand.u32 2147483648, %v105_v48 }
 0x113   :  { %v154_v54 = vand.u32 2147483647, %v105_v48 }
 0x114   :  { %180 = vlog2.f32 %v111_v49  ;;  %v157_v51 = vcvt.s32.f32 %v156_v50 }
 0x115   :  { %vm155_vm2 = vcmp.lt.f32.partialorder %v154_v54, 8388608.0 }
 0x116   :  { %v158_v52 = vand.u32 2147483647, %v157_v51 }
 0x118   :  { %v160_v55 = vor.u32 %v159_v53, %v158_v52 }
 0x11a   :  { %v161_v57 = vsel %vm155_vm2, %v160_v55, %v105_v48 }
 0x11b   :  { %vm119_vm3 = vcmp.eq.f32.partialorder %v161_v57, %v108_v56 }
 0x11c   :  { %v153_v0 = vsel %vm119_vm3, 1.0, %v242_v63 }
 0x11d   :  { %v126_v5 = vsel %vm123_vm5, %v153_v0, %v125_v3 }
 0x11e   :  { %v127_v7 = vsel %vm73_vm0, %v161_v57, %v126_v5 }
 0x11f   :  { %v179_v58 = vpop.eup %178 }
 0x120   :  { %v107_v59 = vmul.f32 0.6931472, %v179_v58 }
 0x121   :  { %v181_v60 = vpop.eup %180 }
 0x122   :  { %v113_v62 = vmul.f32 0.6931472, %v181_v60  ;;  %v109_v1 = vmul.f32 %v108_v56, %v107_v59 }
 0x124   :  { %v115_v2 = vmul.f32 %v114_v61, %v113_v62 }
 0x126   :  { %v116_v4 = vadd.f32 %v115_v2, %v109_v1 }
 0x128   :  { %v117_v6 = vsub.f32 0.0, %v116_v4 }
 0x12a   :  { %v128_v8 = vsel %vm122_vm6, %v117_v6, %v127_v7 }
 0x12b   :  { %129 = vst [vmem:[#allocation7] sm:$0x1] %v128_v8 }
 0x12c   :  { %225 = shalt.err (!%p222_p0)
}
 0x12d   :  { %141 = dma.vmem_to_hbm [thread:$0]  %s139_s30, 16, %s298_s4, [#allocation4]  }
 0x12e   :  { %238 = dma.done.wait [#allocation4], 16  }
 0x12f   :  { %239 = vsyncadd [#allocation4], 4294967280 }
 0x130   :  { %147 = vsyncpa [#allocation3], 1 }
 0x131   :  { %148 = vsyncpa [#allocation4], 1 }
 0x132   :  { %149 = vsyncpa [#allocation5], 1 }

</bundles_post_ra>
